<compile_context>
chip_gen: v7x
topology: tpu7x:2x2x1
jax: 0.10.0
libtpu: 0.0.40
codegen_flags: <defaults>
</compile_context>

<pallas_src>
import functools

import jax
import jax.numpy as jnp
from jax.experimental import pallas as pl
from jax.experimental.pallas import tpu as pltpu


def _sepconv1d_kernel(xm_ref, xl_ref, xr_ref, wdw_ref, wpw_ref, b_ref, o_ref,
                      *, k, tl, halo):
    # xm_ref : (1, tL, C_in)      current L tile of x
    # xl_ref : (1, halo, C_in)    the `halo` rows of x just before this tile (clamped at l=0)
    # xr_ref : (1, halo, C_in)    the `halo` rows of x just after  this tile (clamped at l=nL-1)
    # wdw_ref: (k, C_in)          depthwise weights (tap j, channel c)
    # wpw_ref: (C_in, C_out_p)    pointwise weights (C_out padded to a lane multiple)
    # b_ref  : (1, C_out_p)       bias
    # o_ref  : (1, tL, C_out_p)
    pad = k // 2
    l = pl.program_id(1)
    n_l = pl.num_programs(1)

    xm = xm_ref[0]                                     # (tL, C_in)

    # Zero the halo rows at the sequence boundaries (== Conv1d zero padding of k//2).
    lmask = (l > 0).astype(xm.dtype)
    rmask = (l < n_l - 1).astype(xm.dtype)
    xl = xl_ref[0] * lmask                             # (halo, C_in)
    xr = xr_ref[0] * rmask                             # (halo, C_in)

    # Stitched window [halo | tL | halo]; every piece is sublane-aligned, so the concat
    # needs no sub-tile row shuffles.
    buf = jnp.concatenate([xl, xm, xr], axis=0)        # (tL + 2*halo, C_in)

    wdw = wdw_ref[...].astype(jnp.float32)             # (k, C_in) -- loaded once (hoisted)

    # Depthwise conv, accumulated in f32 on the VPU:
    #   dw[i, c] = sum_j x[n, l*tL + i + j - pad, c] * wdw[j, c]
    #            = sum_j buf[i + base + j, c] * wdw[j, c]
    base = halo - pad
    acc = buf[base:base + tl, :].astype(jnp.float32) * wdw[0, :]
    for j in range(1, k):                              # k is small & static -> fully unrolled
        # NOTE: these shifted slices are sublane-offset; Mosaic lowers them to cross-sublane
        # rotates on the XLU (equivalently one could use pltpu.roll on `buf`).
        acc = acc + buf[base + j:base + j + tl, :].astype(jnp.float32) * wdw[j, :]

    # Pointwise (1x1) conv as an MXU matmul + bias.  Operands stay in the input dtype,
    # accumulation is f32.
    y = jnp.dot(acc.astype(xm.dtype), wpw_ref[...], preferred_element_type=jnp.float32)
    y = y + b_ref[...].astype(jnp.float32)             # (1, C_out_p) broadcasts over tL
    o_ref[0] = y.astype(o_ref.dtype)


def _round_up(a, b):
    return (a + b - 1) // b * b


def separable_conv1d(x, w_dw, w_pw, bias, k, *, tile_l=512):
    """SeparableConv1d forward.

    x    : (N, L, C_in)   -- same layout the PyTorch module's forward consumes.
    w_dw : (C_in, k)      -- torch depthwise weight (C_in, 1, k) squeezed.
    w_pw : (C_out, C_in)  -- torch pointwise weight (C_out, C_in, 1) squeezed.
    bias : (C_out,)
    Returns (N, L, C_out).
    """
    N, L, C_in = x.shape
    C_out = w_pw.shape[0]
    if k % 2 != 1:
        # TODO(synk): even kernel_size (padding=k//2 gives L_out = L + 1) is not supported by
        # the tiled kernel; the module is normally used with odd k.
        raise NotImplementedError("separable_conv1d: only odd kernel_size supported")
    pad = k // 2

    # Sublane granularity: 8 rows for 4-byte dtypes, 16 for 2-byte, 32 for 1-byte.
    row_align = 8 * max(1, 4 // jnp.dtype(x.dtype).itemsize)
    halo = row_align                        # halo block height (>= pad for any k <= 2*halo+1)
    if pad > halo:
        raise NotImplementedError("separable_conv1d: kernel_size too large for halo blocks")

    # L tile: a sublane multiple, default 512 (256-multiple for the MXU), sized so the
    # double-buffered working set stays far below v7x's 32 MiB scoped VMEM budget.
    tl = min(int(tile_l), _round_up(L, row_align))
    tl = _round_up(tl, row_align)

    # Ragged L falls back to zero-padding the tail to a tile multiple (sliced off below); the
    # extra zero rows reproduce Conv1d's right-edge zero padding, so results are exact.
    L_p = _round_up(L, tl)
    if L_p != L:
        x = jnp.pad(x, ((0, 0), (0, L_p - L), (0, 0)))
    n_l = L_p // tl
    blocks_per_tile = tl // halo
    n_halo_blocks = L_p // halo

    # Lane-dense output channels: pad weights/bias (not x!) so the store's last dim is a
    # multiple of 128; no-op whenever C_out already is.
    C_out_p = _round_up(C_out, 128)
    wpw_k = jnp.transpose(w_pw, (1, 0))                      # (C_in, C_out)
    b_k = bias
    if C_out_p != C_out:
        wpw_k = jnp.pad(wpw_k, ((0, 0), (0, C_out_p - C_out)))
        b_k = jnp.pad(b_k, ((0, C_out_p - C_out),))
    wdw_k = jnp.transpose(w_dw, (1, 0))                      # (k, C_in)
    b_k = b_k.reshape(1, C_out_p)

    kernel = functools.partial(_sepconv1d_kernel, k=k, tl=tl, halo=halo)

    out = pl.pallas_call(
        kernel,
        out_shape=jax.ShapeDtypeStruct((N, L_p, C_out_p), x.dtype),
        grid_spec=pltpu.PrefetchScalarGridSpec(
            num_scalar_prefetch=0,
            grid=(N, n_l),
            in_specs=[
                # current L tile
                pl.BlockSpec((1, tl, C_in), lambda n, l: (n, l, 0)),
                # `halo` rows just before the tile (block index clamped at the left edge;
                # kernel zeroes the contribution when l == 0)
                pl.BlockSpec(
                    (1, halo, C_in),
                    lambda n, l: (n, jnp.maximum(l * blocks_per_tile - 1, 0), 0)),
                # `halo` rows just after the tile (clamped at the right edge; zeroed when
                # l == nL - 1)
                pl.BlockSpec(
                    (1, halo, C_in),
                    lambda n, l: (n, jnp.minimum((l + 1) * blocks_per_tile,
                                                 n_halo_blocks - 1), 0)),
                pl.BlockSpec((k, C_in), lambda n, l: (0, 0)),
                pl.BlockSpec((C_in, C_out_p), lambda n, l: (0, 0)),
                pl.BlockSpec((1, C_out_p), lambda n, l: (0, 0)),
            ],
            out_specs=pl.BlockSpec((1, tl, C_out_p), lambda n, l: (n, l, 0)),
        ),
        compiler_params=pltpu.CompilerParams(
            dimension_semantics=("parallel", "parallel")),
    )(x, x, x, wdw_k, wpw_k, b_k)

    if L_p != L or C_out_p != C_out:
        out = out[:, :L, :C_out]
    return out


def _reference(x, w_dw, w_pw, bias, k):
    """Plain-JAX replica of the PyTorch forward (zero-padded depthwise + 1x1 pointwise + bias)."""
    N, L, C_in = x.shape
    pad = k // 2
    xp = jnp.pad(x, ((0, 0), (pad, pad), (0, 0)))
    L_out = L + 2 * pad - k + 1
    dw = jnp.zeros((N, L_out, C_in), jnp.float32)
    for j in range(k):
        dw = dw + xp[:, j:j + L_out, :].astype(jnp.float32) * w_dw[:, j][None, None, :]
    y = jnp.einsum('nlc,oc->nlo', dw, w_pw.astype(jnp.float32),
                   precision=jax.lax.Precision.HIGHEST)
    return y + bias[None, None, :]


if __name__ == "__main__":
    key = jax.random.PRNGKey(0)
    k1, k2, k3, k4, k5, k6, k7 = jax.random.split(key, 7)

    # --- Case 1: module demo shapes (single L tile; zero bias as in __init__) ---
    N, L, C_in, C_out, K = 2, 16, 4, 8, 3
    w_dw = jax.random.normal(k1, (C_in, K), jnp.float32) * (2.0 / (1 * K)) ** 0.5
    w_pw = jax.random.normal(k2, (C_out, C_in), jnp.float32) * (2.0 / C_in) ** 0.5
    bias = jnp.zeros((C_out,), jnp.float32)
    x = jax.random.normal(k3, (N, L, C_in), jnp.float32)

    out = jax.block_until_ready(separable_conv1d(x, w_dw, w_pw, bias, K))
    ref = _reference(x, w_dw, w_pw, bias, K)
    assert out.shape == (N, L, C_out)
    assert jnp.allclose(out, ref, atol=1e-4, rtol=1e-4)

    # --- Case 2: multi-tile L path (cross-tile halo + boundary masking), k=5, real bias ---
    N2, L2, C_in2, C_out2, K2 = 2, 48, 5, 12, 5
    w_dw2 = jax.random.normal(k4, (C_in2, K2), jnp.float32) * (2.0 / K2) ** 0.5
    w_pw2 = jax.random.normal(k5, (C_out2, C_in2), jnp.float32) * (2.0 / C_in2) ** 0.5
    bias2 = jax.random.normal(k6, (C_out2,), jnp.float32)
    x2 = jax.random.normal(k7, (N2, L2, C_in2), jnp.float32)

    out2 = jax.block_until_ready(
        separable_conv1d(x2, w_dw2, w_pw2, bias2, K2, tile_l=16))
    ref2 = _reference(x2, w_dw2, w_pw2, bias2, K2)
    assert out2.shape == (N2, L2, C_out2)
    assert jnp.allclose(out2, ref2, atol=1e-4, rtol=1e-4)

    print("KERNEL_OK")
</pallas_src>

<mosaic_0001>
module attributes {stable_mosaic.version = 11 : i64} {
  func.func @_sepconv1d_kernel(%arg0: i32, %arg1: i32, %arg2: memref<1x16x4xf32, #tpu.memory_space<vmem>>, %arg3: memref<1x8x4xf32, #tpu.memory_space<vmem>>, %arg4: memref<1x8x4xf32, #tpu.memory_space<vmem>>, %arg5: memref<3x4xf32, #tpu.memory_space<vmem>>, %arg6: memref<4x128xf32, #tpu.memory_space<vmem>>, %arg7: memref<1x128xf32, #tpu.memory_space<vmem>>, %arg8: memref<1x16x128xf32, #tpu.memory_space<vmem>>) attributes {dimension_semantics = [#tpu.dimension_semantics<parallel>, #tpu.dimension_semantics<parallel>], iteration_bounds = array<i64: 2, 1>, scalar_prefetch = 0 : i64, scratch_operands = 0 : i64, tpu.core_type = #tpu.core_type<tc>, window_params = [{transform_indices = @transform_0, window_bounds = array<i64: 1, 16, 4>}, {transform_indices = @transform_1, window_bounds = array<i64: 1, 8, 4>}, {transform_indices = @transform_2, window_bounds = array<i64: 1, 8, 4>}, {pipeline_mode = #tpu.pipeline_mode<synchronous>, transform_indices = @transform_3, window_bounds = array<i64: 3, 4>}, {pipeline_mode = #tpu.pipeline_mode<synchronous>, transform_indices = @transform_4, window_bounds = array<i64: 4, 128>}, {pipeline_mode = #tpu.pipeline_mode<synchronous>, transform_indices = @transform_5, window_bounds = array<i64: 1, 128>}, {transform_indices = @transform_6, window_bounds = array<i64: 1, 16, 128>}]} {
    %c0 = arith.constant 0 : index
    %c0_0 = arith.constant 0 : index
    %c0_1 = arith.constant 0 : index
    %0 = vector.load %arg2[%c0, %c0_0, %c0_1] : memref<1x16x4xf32, #tpu.memory_space<vmem>>, vector<1x16x4xf32>
    %1 = vector.shape_cast %0 : vector<1x16x4xf32> to vector<16x4xf32>
    %c0_i32 = arith.constant 0 : i32
    %2 = arith.cmpi sgt, %arg1, %c0_i32 : i32
    %3 = arith.extui %2 : i1 to i32
    %4 = arith.sitofp %3 : i32 to f32
    %c0_i32_2 = arith.constant 0 : i32
    %5 = arith.cmpi slt, %arg1, %c0_i32_2 : i32
    %6 = arith.extui %5 : i1 to i32
    %7 = arith.sitofp %6 : i32 to f32
    %c0_3 = arith.constant 0 : index
    %c0_4 = arith.constant 0 : index
    %c0_5 = arith.constant 0 : index
    %8 = vector.load %arg3[%c0_3, %c0_4, %c0_5] : memref<1x8x4xf32, #tpu.memory_space<vmem>>, vector<1x8x4xf32>
    %9 = vector.shape_cast %8 : vector<1x8x4xf32> to vector<8x4xf32>
    %10 = vector.broadcast %4 : f32 to vector<8x4xf32>
    %11 = arith.mulf %9, %10 : vector<8x4xf32>
    %c0_6 = arith.constant 0 : index
    %c0_7 = arith.constant 0 : index
    %c0_8 = arith.constant 0 : index
    %12 = vector.load %arg4[%c0_6, %c0_7, %c0_8] : memref<1x8x4xf32, #tpu.memory_space<vmem>>, vector<1x8x4xf32>
    %13 = vector.shape_cast %12 : vector<1x8x4xf32> to vector<8x4xf32>
    %14 = vector.broadcast %7 : f32 to vector<8x4xf32>
    %15 = arith.mulf %13, %14 : vector<8x4xf32>
    %16 = tpu.concatenate %11, %1, %15 in 0 : vector<8x4xf32>, vector<16x4xf32>, vector<8x4xf32> -> vector<32x4xf32>
    %c0_9 = arith.constant 0 : index
    %c0_10 = arith.constant 0 : index
    %17 = vector.load %arg5[%c0_9, %c0_10] : memref<3x4xf32, #tpu.memory_space<vmem>>, vector<3x4xf32>
    %18 = vector.extract_strided_slice %16 {offsets = [7, 0], sizes = [16, 4], strides = [1, 1]} : vector<32x4xf32> to vector<16x4xf32>
    %19 = vector.extract_strided_slice %17 {offsets = [0, 0], sizes = [1, 4], strides = [1, 1]} : vector<3x4xf32> to vector<1x4xf32>
    %20 = vector.shape_cast %19 : vector<1x4xf32> to vector<4xf32>
    %21 = vector.shape_cast %20 : vector<4xf32> to vector<1x4xf32>
    %22 = vector.broadcast %21 : vector<1x4xf32> to vector<16x4xf32>
    %23 = arith.mulf %18, %22 : vector<16x4xf32>
    %24 = vector.extract_strided_slice %16 {offsets = [8, 0], sizes = [16, 4], strides = [1, 1]} : vector<32x4xf32> to vector<16x4xf32>
    %25 = vector.extract_strided_slice %17 {offsets = [1, 0], sizes = [1, 4], strides = [1, 1]} : vector<3x4xf32> to vector<1x4xf32>
    %26 = vector.shape_cast %25 : vector<1x4xf32> to vector<4xf32>
    %27 = vector.shape_cast %26 : vector<4xf32> to vector<1x4xf32>
    %28 = vector.broadcast %27 : vector<1x4xf32> to vector<16x4xf32>
    %29 = arith.mulf %24, %28 : vector<16x4xf32>
    %30 = arith.addf %23, %29 : vector<16x4xf32>
    %31 = vector.extract_strided_slice %16 {offsets = [9, 0], sizes = [16, 4], strides = [1, 1]} : vector<32x4xf32> to vector<16x4xf32>
    %32 = vector.extract_strided_slice %17 {offsets = [2, 0], sizes = [1, 4], strides = [1, 1]} : vector<3x4xf32> to vector<1x4xf32>
    %33 = vector.shape_cast %32 : vector<1x4xf32> to vector<4xf32>
    %34 = vector.shape_cast %33 : vector<4xf32> to vector<1x4xf32>
    %35 = vector.broadcast %34 : vector<1x4xf32> to vector<16x4xf32>
    %36 = arith.mulf %31, %35 : vector<16x4xf32>
    %37 = arith.addf %30, %36 : vector<16x4xf32>
    %c0_11 = arith.constant 0 : index
    %c0_12 = arith.constant 0 : index
    %38 = vector.load %arg6[%c0_11, %c0_12] : memref<4x128xf32, #tpu.memory_space<vmem>>, vector<4x128xf32>
    %cst = arith.constant dense<0.000000e+00> : vector<16x128xf32>
    %39 = tpu.matmul %37, %38, %cst {dimension_numbers = #tpu.dot_dimension_numbers<[1], [0], [0], [1], [0, 0, 1, 1], [], []>} : vector<16x4xf32>, vector<4x128xf32>, vector<16x128xf32> -> vector<16x128xf32>
    %c0_13 = arith.constant 0 : index
    %c0_14 = arith.constant 0 : index
    %40 = vector.load %arg7[%c0_13, %c0_14] : memref<1x128xf32, #tpu.memory_space<vmem>>, vector<1x128xf32>
    %41 = vector.broadcast %40 : vector<1x128xf32> to vector<16x128xf32>
    %42 = arith.addf %39, %41 : vector<16x128xf32>
    %c0_15 = arith.constant 0 : index
    %c0_16 = arith.constant 0 : index
    %c0_17 = arith.constant 0 : index
    %43 = vector.load %arg8[%c0_15, %c0_16, %c0_17] : memref<1x16x128xf32, #tpu.memory_space<vmem>>, vector<1x16x128xf32>
    %44 = vector.shape_cast %43 : vector<1x16x128xf32> to vector<16x128xf32>
    %45 = vector.shape_cast %42 : vector<16x128xf32> to vector<1x16x128xf32>
    tpu.vector_store %arg8[%c0_15, %c0_16, %c0_17], %45 {strides = array<i32>} : memref<1x16x128xf32, #tpu.memory_space<vmem>>, vector<1x16x128xf32>,
    return
  }
  func.func @transform_0(%arg0: i32, %arg1: i32) -> (i32, i32, i32) {
    %c0_i32 = arith.constant 0 : i32
    %c0_i32_0 = arith.constant 0 : i32
    return %arg0, %arg1, %c0_i32 : i32, i32, i32
  }
  func.func @transform_1(%arg0: i32, %arg1: i32) -> (i32, i32, i32) {
    %c2_i32 = arith.constant 2 : i32
    %0 = arith.muli %arg1, %c2_i32 : i32
    %c1_i32 = arith.constant 1 : i32
    %1 = arith.subi %0, %c1_i32 : i32
    %c0_i32 = arith.constant 0 : i32
    %2 = arith.maxsi %1, %c0_i32 : i32
    %c0_i32_0 = arith.constant 0 : i32
    %c0_i32_1 = arith.constant 0 : i32
    return %arg0, %2, %c0_i32_0 : i32, i32, i32
  }
  func.func @transform_2(%arg0: i32, %arg1: i32) -> (i32, i32, i32) {
    %c1_i32 = arith.constant 1 : i32
    %0 = arith.addi %arg1, %c1_i32 : i32
    %c2_i32 = arith.constant 2 : i32
    %1 = arith.muli %0, %c2_i32 : i32
    %c1_i32_0 = arith.constant 1 : i32
    %2 = arith.minsi %1, %c1_i32_0 : i32
    %c0_i32 = arith.constant 0 : i32
    %c0_i32_1 = arith.constant 0 : i32
    return %arg0, %2, %c0_i32 : i32, i32, i32
  }
  func.func @transform_3(%arg0: i32, %arg1: i32) -> (i32, i32) {
    %c0_i32 = arith.constant 0 : i32
    %c0_i32_0 = arith.constant 0 : i32
    %c0_i32_1 = arith.constant 0 : i32
    return %c0_i32, %c0_i32_0 : i32, i32
  }
  func.func @transform_4(%arg0: i32, %arg1: i32) -> (i32, i32) {
    %c0_i32 = arith.constant 0 : i32
    %c0_i32_0 = arith.constant 0 : i32
    %c0_i32_1 = arith.constant 0 : i32
    return %c0_i32, %c0_i32_0 : i32, i32
  }
  func.func @transform_5(%arg0: i32, %arg1: i32) -> (i32, i32) {
    %c0_i32 = arith.constant 0 : i32
    %c0_i32_0 = arith.constant 0 : i32
    %c0_i32_1 = arith.constant 0 : i32
    return %c0_i32, %c0_i32_0 : i32, i32
  }
  func.func @transform_6(%arg0: i32, %arg1: i32) -> (i32, i32, i32) {
    %c0_i32 = arith.constant 0 : i32
    %c0_i32_0 = arith.constant 0 : i32
    return %arg0, %arg1, %c0_i32 : i32, i32, i32
  }
}

</mosaic_0001>

<bundles_post_ra>
// kernel: tpu_custom_call.1
= control target key start
LH: loop header
LB: loop body
LE: loop exit
PB: predicated region body
PF: predicated region fallthrough
CT: control target
= control target key end

     0   :  { %11 = vsyncpa [#allocation3], 0  ;;  %s1036_s0 = inlined_call_operand.vmem [shape: f32[2,16,4], index: 0, kind: input, shape index: {}]   ;;  %s1037_s1 = inlined_call_operand.vmem [shape: f32[2,16,4], index: 1, kind: input, shape index: {}]   ;;  %s1038_s2 = inlined_call_operand.vmem [shape: f32[2,16,4], index: 2, kind: input, shape index: {}]   ;;  %s1039_s3 = inlined_call_operand.vmem [shape: f32[3,4], index: 3, kind: input, shape index: {}]   ;;  %s1040_s4 = inlined_call_operand.vmem [shape: f32[4,128], index: 4, kind: input, shape index: {}]   ;;  %s1041_s5 = inlined_call_operand.vmem [shape: f32[1,128], index: 5, kind: input, shape index: {}]   ;;  %s1042_s6 = inlined_call_operand.hbm [shape: f32[2,16,128], index: 6, kind: output, shape index: {}]  }
   0x1   :  { %13 = vsyncpa [#allocation3 + $0x1], 0  ;;  %s905_s21 = smov 0   ;;  %s907_s22 = smov 0  }
   0x2   :  { %s909_s23 = smov 0   ;;  %s911_s24 = smov 0  }
   0x3   :  { %s913_s25 = smov 0   ;;  %s915_s26 = smov 0  }
   0x4 LB: > { %s695_s27 = sadd.s32 4294967295, %s865_s26   ;;  %s696_s28 = sadd.s32 4294967294, %s865_s26   ;;  %s865_s26 = sphi %s915_s26, %s19_s26   ;;  %s861_s25 = sphi %s913_s25, %s1049_s25   ;;  %s857_s24 = sphi %s911_s24, %s1048_s24   ;;  %s853_s23 = sphi %s909_s23, %s1047_s23   ;;  %s849_s22 = sphi %s907_s22, %s1046_s22   ;;  %s845_s21 = sphi %s905_s21, %s1045_s21  }
   0x5   : > { %s31_s29 = sadd.s32 1, %s861_s25  ;;  %s203_s30 = sadd.s32 1, %s853_s23 }
   0x6   : > { %p33_p0 = scmp.ge.s32.totalorder %s31_s29, 2  ;;  %p213_p1 = scmp.ne.s32.totalorder %s853_s23, %s849_s22 }
   0x7   : > { %p214_p2 = scmp.eq.s32.totalorder %s695_s27, 1  ;;  %p219_p3 = scmp.ne.s32.totalorder %s849_s22, %s845_s21 }
   0x8   : > { %s1051_s29 = smov (%p33_p0, %s31_s29), 0  ;;  %p220_p5 = scmp.eq.s32.totalorder %s696_s28, 1 }
   0x9   : > { %p945_p4 = por %p214_p2, %p213_p1  ;;  %s198_s8 = ssub.s32 %s861_s25, %s1051_s29 }
   0xa   : > { %p699_p6 = scmp.ge.s32.totalorder %s865_s26, 1  ;;  %p201_p7 = scmp.eq.s32.totalorder %s198_s8, 0 }
   0xb   : > { %p952_p8 = por %p220_p5, %p219_p3  ;;  %p298_p9 = scmp.lt.s32.totalorder %s865_s26, 3 }
   0xc   : > { %s958_s10 = scalar_select %p201_p7, %s853_s23, %s203_s30  }
   0xd   : > { %p299_p10 = pnand %p699_p6, %p298_p9 }
   0xe   : > { %v461_v0 = vld [vmem:[%s1040_s4] sm:$0xf] (!%p299_p10)  ;;  %vm483_vm0 = vcmask (!%p299_p10), 1043456   ;;  %p357_p11 = scmp.lt.s32.totalorder (!%p299_p10), %s857_s24, 1  ;;  %v414_v1 = vlaneseq (!%p299_p10)  ;;  %vm429_vm1 = vcmask (!%p299_p10), 1046528   ;;  %vm449_vm2 = vcmask (!%p299_p10), 1045504  }
   0xf   : > { %302 = sbr.rel (%p299_p10) target bundleno = 271 (0x10f), region = 44  ;;  %725 = vmatprep.subr.msk.mxu0 (!%p299_p10), %vm483_vm0, %v461_v0  ;;  %v413_v3 = vld [vmem:[%s1039_s3] sm:$0x7] (!%p299_p10)  ;;  %vm472_vm3 = vcmask (!%p299_p10), 1040384   ;;  %vm478_vm4 = vcmask (!%p299_p10), 31744  }
  0x10   : > { %726 = vmatpush3.msk.msra.mxu0 (!%p299_p10), %vm483_vm0, %v461_v0  ;;  %v415_v2 = vshrl.u32 (!%p299_p10), %v414_v1, 7  ;;  %v707_v43 = vld [vmem:[%s1041_s5] ss:$0 sm:$0xff] (!%p299_p10) }
  0x12   : > { %v416_v4 = vsub.s32 (!%p299_p10), 0, %v415_v2  ;;  %v423_v5 = vsub.s32 (!%p299_p10), 1, %v415_v2  ;;  %v441_v6 = vsub.s32 (!%p299_p10), 2, %v415_v2 }
  0x14   : > { %v417_v10 = vrot.slane (!%p299_p10), %v413_v3, %v416_v4  ;;  %v424_v11 = vrot.slane (!%p299_p10), %v413_v3, %v423_v5  ;;  %v442_v12 = vrot.slane (!%p299_p10), %v413_v3, %v441_v6 }
  0x16   : > { %s358_s13 = scalar_select %p357_p11, %s857_s24, 1 }
  0x18   : > { %s716_s16 = sshll.u32 %s358_s13, 4  ;;  %s353_s13 = sand.u32 1, %s849_s22  }
  0x19   : > { %s364_s19 = scalar_lea.vmem %s1036_s0, %s716_s16  ;;  %s377_s28 = scalar_lea.vmem %s1037_s1, %s716_s16 }
  0x1a   : > { %s719_s30 = sadd.s32 8, %s716_s16  ;;  %v399_v7 = vld [vmem:[%s364_s19] sm:$0xff]  ;;  %v400_v8 = vld [vmem:[%s364_s19 + $0x8] sm:$0xff]  ;;  %s700_s14 = sshll.u32 %s353_s13, 4 }
  0x1b   : > { %v407_v9 = vld [vmem:[%s377_s28] sm:$0xff]  ;;  %s393_s12 = scalar_lea.vmem %s1038_s2, %s719_s30  ;;  %v419_v15 = vmul.f32 %v417_v10, %v399_v7  ;;  %v425_v16 = vmul.f32 %v424_v11, %v399_v7  ;;  %v426_v17 = vmul.f32 %v424_v11, %v400_v8  ;;  %v443_v18 = vmul.f32 %v442_v12, %v399_v7  ;;  %s355_s17 = scalar_lea.vmem [#allocation2], %s700_s14 }
  0x1c   : > { %v409_v13 = vmul.f32 0.0, %v407_v9  ;;  %v410_v14 = vld [vmem:[%s393_s12] sm:$0xff]  ;;  %v444_v20 = vmul.f32 %v442_v12, %v400_v8  ;;  %v420_v22 = vmul.f32 %v417_v10, %v400_v8  ;;  %s580_s18 = sshll.u32 %s355_s17, 4  ;;  %s720_s19 = sshll.u32 %s857_s24, 8  ;;  %s983_s18 = int_to_ptr.vmem [resolvable:$true] %s580_s18 }
  0x1d   : > { %v412_v21 = vmul.f32 0.0, %v410_v14  ;;  %v430_v23 = vrot.slane %v425_v16, 1  ;;  %v431_v24 = vrot.slane %v426_v17, 1  ;;  %v450_v25 = vrot.slane %v443_v18, 2  ;;  %s988_s28 = scalar_lea.hbm %s1042_s6, %s720_s19  ;;  %s990_s30 = scalar_lea.sflag [#allocation3], %s353_s13 }
  0x1e   : > { %v418_v19 = vmul.f32 %v417_v10, %v409_v13  ;;  %v451_v26 = vrot.slane %v444_v20, 2  ;;  %s787_s8 = scalar_lea.vmem %s983_s18, 256  ;;  %s867_s24 = smov [#allocation2]  }
  0x1f   : > { %v445_v27 = vmul.f32 %v442_v12, %v412_v21  ;;  %v432_v28 = vsel %vm429_vm1, %v430_v23, %v431_v24  ;;  %v438_v30 = vadd.f32 %v431_v24, %v420_v22  ;;  %p788_p12 = scmp.ne.s32.totalorder %s983_s18, %s787_s8  ;;  %s791_s11 = sshll.u32 %s867_s24, 4  ;;  %s792_s11 = int_to_ptr.vmem [resolvable:$false] %s791_s11 }
  0x20   : > { %v436_v29 = vadd.f32 %v430_v23, %v418_v19  ;;  %v437_v31 = vadd.f32 %v432_v28, %v419_v15  ;;  %v452_v32 = vsel %vm449_vm2, %v450_v25, %v451_v26  ;;  %s793_s12 = scalar_lea.vmem %s792_s11, 512  ;;  %p794_p1 = scmp.lt.s32.totalorder %s983_s18, %s792_s11 }
  0x21   : > { %v453_v33 = vrot.slane %v445_v27, 2  ;;  %p789_p13 = pnand %p788_p12, %p945_p4  ;;  %p795_p2 = scmp.lt.s32.totalorder %s793_s12, %s787_s8 }
  0x22   : > { %v458_v34 = vadd.f32 %v450_v25, %v436_v29  ;;  %v459_v35 = vadd.f32 %v452_v32, %v437_v31 }
  0x23   : > { %v454_v36 = vsel %vm449_vm2, %v451_v26, %v453_v33  ;;  %p790_p0 = pneg %p789_p13  ;;  %p796_p3 = por %p795_p2, %p794_p1 }
  0x24   : > { %v473_v37 = vrot.slane %v458_v34, 7  ;;  %v460_v38 = vadd.f32 %v454_v36, %v438_v30  ;;  %v474_v39 = vrot.slane %v459_v35, 7 }
  0x25   : > { %p797_p5 = pnand %p796_p3, %p790_p0 }
  0x26   : > { %v476_v40 = vrot.slane %v460_v38, 7  ;;  %v475_v41 = vsel %vm472_vm3, %v473_v37, %v474_v39 }
  0x27   : > { %727 = vmatprep.mubr.msk.f32.mxu0 %vm478_vm4, %v475_v41 }
  0x28   : > { %v477_v42 = vsel %vm472_vm3, %v474_v39, %v476_v40 }
  0x29   : > { %728 = vmatmul.mubr.msk.f32.vlgmr.msra.gmra.mrb[0].mxu0 %vm478_vm4, %v477_v42 }
  0xfc   : > { %v729_v44 = vpop.f32.mrb[0].mxu0 }
  0xfd   : > { %v559_v45 = vadd.f32 %v729_v44, %v707_v43  ;;  %v553_v46 = vpop.f32.mrb[1].mxu0 }
  0xfe   : > { %v554_v47 = vadd.f32 %v707_v43, %v553_v46 }
  0xff   : > { %563 = vst [vmem:[%s355_s17 + $0x8] sm:$0xff] %v559_v45 }
 0x100   : > { %562 = vst [vmem:[%s355_s17] sm:$0xff] %v554_v47 }
 0x101   : > { %800 = shalt.err (!%p797_p5)
}
 0x102   : > { %s801_s13 = scalar_lea.hbm %s988_s28, 256  ;;  %s805_s16 = scalar_lea.hbm %s1042_s6, 512 }
 0x103   : > { %p802_p6 = scmp.ne.s32.totalorder %s988_s28, %s801_s13  ;;  %p806_p10 = scmp.lt.u32.totalorder %s988_s28, %s1042_s6 }
 0x104   : > { %p807_p11 = scmp.lt.u32.totalorder %s805_s16, %s801_s13  ;;  %p809_p13 = scmp.lt.u32.totalorder %s801_s13, %s988_s28 }
 0x105   : > { %p803_p7 = pnand %p802_p6, %p945_p4 }
 0x106   : > { %p808_p12 = por %p807_p11, %p806_p10 }
 0x107   : > { %p804_p9 = pneg %p803_p7 }
 0x108   : > { %p810_p0 = por %p809_p13, %p808_p12 }
 0x10a   : > { %p811_p1 = pnand %p810_p0, %p804_p9 }
 0x10c   : > { %814 = shalt.err (!%p811_p1)
}
 0x10d   : > { %s868_s20 = smov 128   ;;  %s869_s27 = smov 8  }
 0x10e   : > { %730 = dma.vmem_to_hbm [thread:$0]  (%p945_p4), %s983_s18, 256, %s988_s28, %s990_s30, %s868_s20, %s868_s20, %s869_s27  }
 0x10f PF: > { %p736_p2 = scmp.ge.s32.totalorder %s865_s26, 2  ;;  %s595_s8 = sand.u32 1, %s845_s21  }
 0x110   : > { %s596_s24 = scalar_lea.sflag [#allocation3], %s595_s8 }
 0x111   : > { %p733_p3 = pnand %p736_p2, %p952_p8 }
 0x113   : > { %840 = dma.done.wait (!%p733_p3), %s596_s24, 256  }
 0x114   : > { %842 = vsyncadd (!%p733_p3), %s596_s24, 4294967040  ;;  %s19_s26 = sadd.s32 1, %s865_s26   ;;  %s1045_s21 = smov %s849_s22 }
 0x115   : > { %p16_p5 = scmp.ge.s32.totalorder %s19_s26, 4   ;;  %s1046_s22 = smov %s853_s23 }
 0x116   : > { %s1047_s23 = smov %s958_s10  ;;  %s1048_s24 = smov %s861_s25 }
 0x117   : > { %s1049_s25 = smov %s1051_s29  ;;  %18 = sbr.rel (!%p16_p5) target bundleno = 4 (0x4), region = 85 }
 0x11e   :  { %601 = vsyncpa [#allocation3], 1 }
 0x11f   :  { %603 = vsyncpa [#allocation3 + $0x1], 1 }

</bundles_post_ra>
